<compile_context>
chip_gen: v7x
topology: tpu7x:2x2x1
jax: 0.10.0
libtpu: 0.0.40
codegen_flags: <defaults>
</compile_context>

<pallas_src>
import jax
import jax.numpy as jnp
from jax.experimental import pallas as pl
from jax.experimental.pallas import tpu as pltpu


def _upsample2x_kernel(uw_ref, x_ref, o_ref):
    # uw_ref: (W, 2W) 0/1 replication matrix, Uw[w, 2w+b] = 1
    # x_ref : (TM, W)  tile of the flattened (N*C*H, W) rows
    # o_ref : (TM, 4W) output tile; lanes [0:2W] and [2W:4W] hold the two
    #         height-duplicated copies of the width-upsampled row.
    t = jnp.dot(x_ref[...], uw_ref[...], preferred_element_type=jnp.float32)
    t = t.astype(o_ref.dtype)
    w2 = t.shape[-1]
    o_ref[:, :w2] = t
    o_ref[:, w2:] = t


def _pick_row_tile(rows, w, itemsize):
    """Largest power-of-two row tile dividing `rows` whose (input + output)
    block stays under ~4 MiB, so double-buffering fits the default scoped VMEM
    on every generation (v5e 16 MiB, v6e/v7x 32 MiB)."""
    budget_bytes = 4 * 1024 * 1024
    row_bytes = 5 * w * itemsize  # W input + 4W output elements per row
    cap = max(8, budget_bytes // max(1, row_bytes))
    best = 0
    d = 8
    while d <= rows:
        if rows % d == 0 and d <= cap:
            best = d
        d *= 2
    return best if best > 0 else rows


def my_upsample(x):
    """2x nearest-neighbor upsample == PyTorch myUpsample.forward.

    x: (N, C, H, W) -> (N, C, 2H, 2W) with out[n, c, 2h+a, 2w+b] = x[n, c, h, w].
    Assumes a floating dtype (f32 / bf16): the 0/1 replication matmul with f32
    accumulation reproduces the duplication exactly.
    """
    N, C, H, W = x.shape
    rows = N * C * H
    itemsize = jnp.dtype(x.dtype).itemsize

    x2 = x.reshape(rows, W)                      # free, contiguous reshape
    tm = _pick_row_tile(rows, W, itemsize)
    grid = (rows // tm,)

    # 0/1 width-replication matrix in the input dtype: Uw[w, 2w+b] = 1.
    # TODO(synk): for very large W (>~1024) tile Uw as a reused (tw, 2*tw)
    # constant block instead of materializing the full (W, 2W) matrix.
    uw = (jnp.arange(W)[:, None] == (jnp.arange(2 * W)[None, :] // 2)).astype(x.dtype)

    in_bytes = rows * W * itemsize + W * 2 * W * itemsize
    out_bytes = rows * 4 * W * itemsize
    cost = pl.CostEstimate(
        flops=2 * rows * W * (2 * W),
        transcendentals=0,
        bytes_accessed=in_bytes + out_bytes,
    )

    out2 = pl.pallas_call(
        _upsample2x_kernel,
        out_shape=jax.ShapeDtypeStruct((rows, 4 * W), x.dtype),
        grid=grid,
        in_specs=[
            pl.BlockSpec((W, 2 * W), lambda i: (0, 0)),   # Uw, resident across steps
            pl.BlockSpec((tm, W), lambda i: (i, 0)),      # TM flattened rows per step
        ],
        out_specs=pl.BlockSpec((tm, 4 * W), lambda i: (i, 0)),
        compiler_params=pltpu.CompilerParams(
            dimension_semantics=("parallel",),            # disjoint output blocks
        ),
        cost_estimate=cost,
    )(uw, x2)

    # (rows, 4W) row-major layout == (N, C, H, 2, 2W) == (N, C, 2H, 2W): free reshape.
    return out2.reshape(N, C, 2 * H, 2 * W)


if __name__ == "__main__":
    key = jax.random.PRNGKey(0)
    N, C, H, W = 2, 4, 16, 16
    x = jax.random.normal(key, (N, C, H, W), dtype=jnp.float32)

    y = jax.block_until_ready(my_upsample(x))

    # Pure-JAX reference mirroring the PyTorch expand+reshape semantics.
    ref = jnp.broadcast_to(
        x[:, :, :, None, :, None], (N, C, H, 2, W, 2)
    ).reshape(N, C, 2 * H, 2 * W)

    assert y.shape == (N, C, 2 * H, 2 * W)
    assert y.dtype == x.dtype
    assert jnp.allclose(y, ref, atol=1e-6, rtol=1e-6)
    print("KERNEL_OK")
</pallas_src>

<mosaic_0001>
module attributes {stable_mosaic.version = 11 : i64} {
  func.func @_upsample2x_kernel(%arg0: i32, %arg1: memref<16x32xf32, #tpu.memory_space<vmem>>, %arg2: memref<128x16xf32, #tpu.memory_space<vmem>>, %arg3: memref<128x64xf32, #tpu.memory_space<vmem>>) attributes {dimension_semantics = [#tpu.dimension_semantics<parallel>], iteration_bounds = array<i64: 1>, scalar_prefetch = 0 : i64, scratch_operands = 0 : i64, tpu.core_type = #tpu.core_type<tc>, window_params = [{pipeline_mode = #tpu.pipeline_mode<synchronous>, transform_indices = @transform_0, window_bounds = array<i64: 16, 32>}, {transform_indices = @transform_1, window_bounds = array<i64: 128, 16>}, {transform_indices = @transform_2, window_bounds = array<i64: 128, 64>}]} {
    %c0 = arith.constant 0 : index
    %c0_0 = arith.constant 0 : index
    %0 = vector.load %arg2[%c0, %c0_0] : memref<128x16xf32, #tpu.memory_space<vmem>>, vector<128x16xf32>
    %c0_1 = arith.constant 0 : index
    %c0_2 = arith.constant 0 : index
    %1 = vector.load %arg1[%c0_1, %c0_2] : memref<16x32xf32, #tpu.memory_space<vmem>>, vector<16x32xf32>
    %cst = arith.constant dense<0.000000e+00> : vector<128x32xf32>
    %2 = tpu.matmul %0, %1, %cst {dimension_numbers = #tpu.dot_dimension_numbers<[1], [0], [0], [1], [0, 0, 1, 1], [], []>} : vector<128x16xf32>, vector<16x32xf32>, vector<128x32xf32> -> vector<128x32xf32>
    %c0_3 = arith.constant 0 : index
    %c0_4 = arith.constant 0 : index
    %3 = vector.load %arg3[%c0_3, %c0_4] : memref<128x64xf32, #tpu.memory_space<vmem>>, vector<128x32xf32>
    tpu.vector_store %arg3[%c0_3, %c0_4], %2 {strides = array<i32>} : memref<128x64xf32, #tpu.memory_space<vmem>>, vector<128x32xf32>,
    %c0_5 = arith.constant 0 : index
    %c32 = arith.constant 32 : index
    %4 = vector.load %arg3[%c0_5, %c32] : memref<128x64xf32, #tpu.memory_space<vmem>>, vector<128x32xf32>
    tpu.vector_store %arg3[%c0_5, %c32], %2 {strides = array<i32>} : memref<128x64xf32, #tpu.memory_space<vmem>>, vector<128x32xf32>,
    return
  }
  func.func @transform_0(%arg0: i32) -> (i32, i32) {
    %c0_i32 = arith.constant 0 : i32
    %c0_i32_0 = arith.constant 0 : i32
    %c0_i32_1 = arith.constant 0 : i32
    return %c0_i32, %c0_i32_0 : i32, i32
  }
  func.func @transform_1(%arg0: i32) -> (i32, i32) {
    %c0_i32 = arith.constant 0 : i32
    %c0_i32_0 = arith.constant 0 : i32
    return %arg0, %c0_i32 : i32, i32
  }
  func.func @transform_2(%arg0: i32) -> (i32, i32) {
    %c0_i32 = arith.constant 0 : i32
    %c0_i32_0 = arith.constant 0 : i32
    return %arg0, %c0_i32 : i32, i32
  }
}

</mosaic_0001>

<bundles_post_ra>
// kernel: tpu_custom_call.1
= control target key start
LH: loop header
LB: loop body
LE: loop exit
PB: predicated region body
PF: predicated region fallthrough
CT: control target
= control target key end

     0   :  { %vm29_vm0 = vcmask 130048   ;;  %vm223_vm1 = vcmask 261120   ;;  %s394_s19 = smov 32   ;;  %vm304_vm2 = vcmask 523520   ;;  %s624_s0 = inlined_call_operand.vmem [shape: f32[16,32], index: 0, kind: input, shape index: {}]   ;;  %s625_s1 = inlined_call_operand.vmem [shape: f32[128,16], index: 1, kind: input, shape index: {}]   ;;  %s626_s2 = inlined_call_operand.vmem [shape: f32[128,64], index: 2, kind: output, shape index: {}]  }
   0x1   :  { %v27_v0 = vld [vmem:[%s624_s0] sm:$0xff]  ;;  %v28_v1 = vld [vmem:[%s624_s0 + $0x8] sm:$0xff]  ;;  %v13_v7 = vld [vmem:[%s625_s1 + $0x10] sm:$0xff] }
   0x2   :  { %v11_v2 = vld [vmem:[%s625_s1] sm:$0xff]  ;;  %v387_v3 = vpack.c.bf16 %v28_v1, %v27_v0  ;;  %v12_v5 = vld [vmem:[%s625_s1 + $0x8] sm:$0xff]  ;;  %v21_v8 = vld [vmem:[%s625_s1 + $0x50] sm:$0xff] }
   0x3   :  { %363 = vmatprep.mubr.msk.f32.mxu0 %vm29_vm0, %v11_v2  ;;  %v19_v4 = vld [vmem:[%s625_s1 + $0x40] sm:$0xff]  ;;  %v20_v6 = vld [vmem:[%s625_s1 + $0x48] sm:$0xff]  ;;  %v14_v9 = vld [vmem:[%s625_s1 + $0x18] sm:$0xff] }
   0x4   :  { %375 = vmatprep.mubr.msk.f32.mxu1 %vm29_vm0, %v19_v4  ;;  %388 = vmatprep.subr.bf16.mxu0 %v387_v3  ;;  %v22_v10 = vld [vmem:[%s625_s1 + $0x58] sm:$0xff]  ;;  %v15_v11 = vld [vmem:[%s625_s1 + $0x20] sm:$0xff]  ;;  %v16_v13 = vld [vmem:[%s625_s1 + $0x28] sm:$0xff] }
   0x5   :  { %391 = vmatprep.subr.bf16.mxu1 %v387_v3  ;;  %390 = vmatpush3.bf16.msra.mxu0 %v387_v3  ;;  %v23_v12 = vld [vmem:[%s625_s1 + $0x60] sm:$0xff]  ;;  %v24_v14 = vld [vmem:[%s625_s1 + $0x68] sm:$0xff]  ;;  %v17_v15 = vld [vmem:[%s625_s1 + $0x30] sm:$0xff] }
   0x6   :  { %392 = vmatpush3.bf16.msra.mxu1 %v387_v3  ;;  %v25_v16 = vld [vmem:[%s625_s1 + $0x70] sm:$0xff]  ;;  %v18_v17 = vld [vmem:[%s625_s1 + $0x38] sm:$0xff] }
   0x7   :  { %v26_v18 = vld [vmem:[%s625_s1 + $0x78] sm:$0xff] }
   0x8   :  { %364 = vmatmul.mubr.msk.f32.vlgmr.msra.gmra.mrb[0].mxu0 %vm29_vm0, %v12_v5 }
   0x9   :  { %376 = vmatmul.mubr.msk.f32.vlgmr.msra.gmra.mrb[0].mxu1 %vm29_vm0, %v20_v6  ;;  %366 = vmatprep.mubr.msk.f32.mxu0 %vm29_vm0, %v13_v7 }
   0xa   :  { %378 = vmatprep.mubr.msk.f32.mxu1 %vm29_vm0, %v21_v8 }
   0xc   :  { %367 = vmatmul.mubr.msk.f32.gmra.mrb[2].mxu0 %vm29_vm0, %v14_v9 }
   0xd   :  { %379 = vmatmul.mubr.msk.f32.gmra.mrb[2].mxu1 %vm29_vm0, %v22_v10  ;;  %369 = vmatprep.mubr.msk.f32.mxu0 %vm29_vm0, %v15_v11 }
   0xe   :  { %381 = vmatprep.mubr.msk.f32.mxu1 %vm29_vm0, %v23_v12 }
  0x10   :  { %370 = vmatmul.mubr.msk.f32.gmra.mrb[4].mxu0 %vm29_vm0, %v16_v13 }
  0x11   :  { %382 = vmatmul.mubr.msk.f32.gmra.mrb[4].mxu1 %vm29_vm0, %v24_v14  ;;  %372 = vmatprep.mubr.msk.f32.mxu0 %vm29_vm0, %v17_v15 }
  0x12   :  { %384 = vmatprep.mubr.msk.f32.mxu1 %vm29_vm0, %v25_v16 }
  0x14   :  { %373 = vmatmul.mubr.msk.f32.gmra.mrb[6].mxu0 %vm29_vm0, %v18_v17 }
  0x15   :  { %385 = vmatmul.mubr.msk.f32.gmra.mrb[6].mxu1 %vm29_vm0, %v26_v18 }
  0xdb   :  { %v365_v19 = vpop.f32.mrb[0].mxu0 }
  0xdc   :  { %v377_v20 = vpop.f32.mrb[0].mxu1  ;;  %225 = vst.msk [vmem:[%s626_s2 + $0x8] sm:$0xff] %vm223_vm1, %v365_v19  ;;  %258 = vrot.lane.b32.xlu0 %v365_v19, %s394_s19  ;;  %v144_v22 = vpop.f32.mrb[1].mxu0 }
  0xdd   :  { %233 = vst.msk [vmem:[%s626_s2 + $0x48] sm:$0xff] %vm223_vm1, %v377_v20  ;;  %274 = vrot.lane.b32.xlu1 %v377_v20, %s394_s19  ;;  %v184_v21 = vpop.f32.mrb[1].mxu1  ;;  %224 = vst.msk [vmem:[%s626_s2] sm:$0xff] %vm223_vm1, %v144_v22 }
  0xde   :  { %232 = vst.msk [vmem:[%s626_s2 + $0x40] sm:$0xff] %vm223_vm1, %v184_v21 }
  0xdf   :  { %v368_v23 = vpop.f32.mrb[2].mxu0 }
  0xe0   :  { %v380_v24 = vpop.f32.mrb[2].mxu1  ;;  %227 = vst.msk [vmem:[%s626_s2 + $0x18] sm:$0xff] %vm223_vm1, %v368_v23  ;;  %256 = vrot.lane.b32.xlu0 %v144_v22, %s394_s19  ;;  %v154_v25 = vpop.f32.mrb[3].mxu0 }
  0xe1   :  { %262 = vrot.lane.b32.xlu1 %v368_v23, %s394_s19  ;;  %235 = vst.msk [vmem:[%s626_s2 + $0x58] sm:$0xff] %vm223_vm1, %v380_v24  ;;  %v194_v26 = vpop.f32.mrb[3].mxu1  ;;  %226 = vst.msk [vmem:[%s626_s2 + $0x10] sm:$0xff] %vm223_vm1, %v154_v25 }
  0xe2   :  { %234 = vst.msk [vmem:[%s626_s2 + $0x50] sm:$0xff] %vm223_vm1, %v194_v26 }
  0xe3   :  { %v371_v27 = vpop.f32.mrb[4].mxu0 }
  0xe4   :  { %v383_v28 = vpop.f32.mrb[4].mxu1  ;;  %272 = vrot.lane.b32.xlu0 %v184_v21, %s394_s19  ;;  %229 = vst.msk [vmem:[%s626_s2 + $0x28] sm:$0xff] %vm223_vm1, %v371_v27  ;;  %v164_v29 = vpop.f32.mrb[5].mxu0 }
  0xe5   :  { %278 = vrot.lane.b32.xlu1 %v380_v24, %s394_s19  ;;  %237 = vst.msk [vmem:[%s626_s2 + $0x68] sm:$0xff] %vm223_vm1, %v383_v28  ;;  %v204_v30 = vpop.f32.mrb[5].mxu1  ;;  %228 = vst.msk [vmem:[%s626_s2 + $0x20] sm:$0xff] %vm223_vm1, %v164_v29 }
  0xe6   :  { %236 = vst.msk [vmem:[%s626_s2 + $0x60] sm:$0xff] %vm223_vm1, %v204_v30 }
  0xe7   :  { %v374_v31 = vpop.f32.mrb[6].mxu0 }
  0xe8   :  { %v386_v32 = vpop.f32.mrb[6].mxu1  ;;  %276 = vrot.lane.b32.xlu0 %v194_v26, %s394_s19  ;;  %231 = vst.msk [vmem:[%s626_s2 + $0x38] sm:$0xff] %vm223_vm1, %v374_v31  ;;  %v174_v33 = vpop.f32.mrb[7].mxu0 }
  0xe9   :  { %260 = vrot.lane.b32.xlu1 %v154_v25, %s394_s19  ;;  %239 = vst.msk [vmem:[%s626_s2 + $0x78] sm:$0xff] %vm223_vm1, %v386_v32  ;;  %v214_v34 = vpop.f32.mrb[7].mxu1  ;;  %230 = vst.msk [vmem:[%s626_s2 + $0x30] sm:$0xff] %vm223_vm1, %v174_v33 }
  0xea   :  { %238 = vst.msk [vmem:[%s626_s2 + $0x70] sm:$0xff] %vm223_vm1, %v214_v34 }
  0xec   :  { %264 = vrot.lane.b32.xlu0 %v164_v29, %s394_s19 }
  0xed   :  { %266 = vrot.lane.b32.xlu1 %v371_v27, %s394_s19 }
  0xf0   :  { %280 = vrot.lane.b32.xlu0 %v204_v30, %s394_s19 }
  0xf1   :  { %282 = vrot.lane.b32.xlu1 %v383_v28, %s394_s19 }
  0xf4   :  { %268 = vrot.lane.b32.xlu0 %v174_v33, %s394_s19 }
  0xf5   :  { %270 = vrot.lane.b32.xlu1 %v374_v31, %s394_s19 }
  0xf8   :  { %284 = vrot.lane.b32.xlu0 %v214_v34, %s394_s19 }
  0xf9   :  { %286 = vrot.lane.b32.xlu1 %v386_v32, %s394_s19 }
 0x14e   :  { %v259_v36 = vpop.permute.xlu0 %258 }
 0x14f   :  { %v275_v35 = vpop.permute.xlu1 %274  ;;  %306 = vst.msk [vmem:[%s626_s2 + $0x8] sm:$0xff] %vm304_vm2, %v259_v36 }
 0x150   :  { %314 = vst.msk [vmem:[%s626_s2 + $0x48] sm:$0xff] %vm304_vm2, %v275_v35 }
 0x152   :  { %v257_v37 = vpop.permute.xlu0 %256 }
 0x153   :  { %v263_v38 = vpop.permute.xlu1 %262  ;;  %305 = vst.msk [vmem:[%s626_s2] sm:$0xff] %vm304_vm2, %v257_v37 }
 0x154   :  { %308 = vst.msk [vmem:[%s626_s2 + $0x18] sm:$0xff] %vm304_vm2, %v263_v38 }
 0x156   :  { %v273_v39 = vpop.permute.xlu0 %272 }
 0x157   :  { %v279_v40 = vpop.permute.xlu1 %278  ;;  %313 = vst.msk [vmem:[%s626_s2 + $0x40] sm:$0xff] %vm304_vm2, %v273_v39 }
 0x158   :  { %316 = vst.msk [vmem:[%s626_s2 + $0x58] sm:$0xff] %vm304_vm2, %v279_v40 }
 0x15a   :  { %v277_v41 = vpop.permute.xlu0 %276 }
 0x15b   :  { %v261_v42 = vpop.permute.xlu1 %260  ;;  %315 = vst.msk [vmem:[%s626_s2 + $0x50] sm:$0xff] %vm304_vm2, %v277_v41 }
 0x15c   :  { %307 = vst.msk [vmem:[%s626_s2 + $0x10] sm:$0xff] %vm304_vm2, %v261_v42 }
 0x15e   :  { %v265_v44 = vpop.permute.xlu0 %264 }
 0x15f   :  { %v267_v43 = vpop.permute.xlu1 %266  ;;  %309 = vst.msk [vmem:[%s626_s2 + $0x20] sm:$0xff] %vm304_vm2, %v265_v44 }
 0x160   :  { %310 = vst.msk [vmem:[%s626_s2 + $0x28] sm:$0xff] %vm304_vm2, %v267_v43 }
 0x162   :  { %v281_v46 = vpop.permute.xlu0 %280 }
 0x163   :  { %v283_v45 = vpop.permute.xlu1 %282  ;;  %317 = vst.msk [vmem:[%s626_s2 + $0x60] sm:$0xff] %vm304_vm2, %v281_v46 }
 0x164   :  { %318 = vst.msk [vmem:[%s626_s2 + $0x68] sm:$0xff] %vm304_vm2, %v283_v45 }
 0x166   :  { %v269_v48 = vpop.permute.xlu0 %268 }
 0x167   :  { %v271_v47 = vpop.permute.xlu1 %270  ;;  %311 = vst.msk [vmem:[%s626_s2 + $0x30] sm:$0xff] %vm304_vm2, %v269_v48 }
 0x168   :  { %312 = vst.msk [vmem:[%s626_s2 + $0x38] sm:$0xff] %vm304_vm2, %v271_v47 }
 0x16a   :  { %v285_v50 = vpop.permute.xlu0 %284 }
 0x16b   :  { %v287_v49 = vpop.permute.xlu1 %286  ;;  %319 = vst.msk [vmem:[%s626_s2 + $0x70] sm:$0xff] %vm304_vm2, %v285_v50 }
 0x16c   :  { %320 = vst.msk [vmem:[%s626_s2 + $0x78] sm:$0xff] %vm304_vm2, %v287_v49 }

</bundles_post_ra>
